<compile_context>
chip_gen: v7x
topology: tpu7x:2x2x1
jax: 0.10.0
libtpu: 0.0.40
codegen_flags: <defaults>
</compile_context>

<pallas_src>
import functools
import numpy as np
import jax
import jax.numpy as jnp
from jax.experimental import pallas as pl
from jax.experimental.pallas import tpu as pltpu


EMBED_DIM = 16                      # module hardcodes Linear(16, 16) heads
LANES = 128
FIELDS_PER_ROW = LANES // EMBED_DIM   # 8 field-embeddings per 128-lane row
TB_MAX = 1024                       # batch tile (fits easily in 64 MiB v7x VMEM)


def _round_up(x, m):
    return ((x + m - 1) // m) * m


# ---------------------------------------------------------------------------
# Pallas kernel
# ---------------------------------------------------------------------------
def nfm_kernel(shared_ref, dom_ref, lin_ref,
               bnsh_ref, bndom_ref, kqvw_ref, kqvb_ref,
               w1_ref, b1_ref, bn1_ref, w2t_ref, b2_ref,
               pred_ref, term_ref):
    E = EMBED_DIM
    TB = pred_ref.shape[0]

    def collapse(p):
        # (TB, 128) -> (TB, 16): sum the 8 interleaved 16-wide segments via
        # lane rotations (XLU slot, nearly free).
        p = p + pltpu.roll(p, shift=64, axis=1)
        p = p + pltpu.roll(p, shift=32, axis=1)
        p = p + pltpu.roll(p, shift=16, axis=1)
        return p[:, :E]

    def fm(x_ref):
        # x_ref: (G, TB, 128) bf16 — lane-packed fields; accumulate in f32.
        x = x_ref[...].astype(jnp.float32)
        s = collapse(jnp.sum(x, axis=0))         # full sum over fields  (TB, E)
        sq = collapse(jnp.sum(x * x, axis=0))    # sum of squares        (TB, E)
        return 0.5 * (s * s - sq)

    def bn(x, ss_ref):
        ss = ss_ref[...]                         # (2, C): folded [scale, shift]
        return x * ss[0:1, :] + ss[1:2, :]

    shared_term = bn(fm(shared_ref), bnsh_ref)   # (TB, E)
    dom_term = bn(fm(dom_ref), bndom_ref)        # (TB, E)

    # Fused K|Q|V projection for both terms in one MXU matmul.
    both = jnp.concatenate([dom_term, shared_term], axis=0)          # (2*TB, E)
    proj = jnp.dot(both, kqvw_ref[...],
                   preferred_element_type=jnp.float32) + kqvb_ref[...]  # (2*TB, 48)
    dK, dQ, dV = proj[:TB, 0:E], proj[:TB, E:2 * E], proj[:TB, 2 * E:3 * E]
    sK, sQ, sV = proj[TB:, 0:E], proj[TB:, E:2 * E], proj[TB:, 2 * E:3 * E]

    d_sc = jnp.sum(dK * dQ, axis=1, keepdims=True) * 0.25            # (TB, 1)
    s_sc = jnp.sum(sK * sQ, axis=1, keepdims=True) * 0.25
    m = jnp.maximum(d_sc, s_sc)                  # numerically safe exp
    d_a = jnp.exp(d_sc - m)
    s_a = jnp.exp(s_sc - m)
    inv = pl.reciprocal(d_a + s_a, approx=True)  # one EUP vrcp instead of 2 divides
    term = (d_a * inv) * dV + (s_a * inv) * sV   # (TB, E)
    term_ref[...] = term

    # MLP: Linear -> BatchNorm1d (eval) -> ReLU -> Dropout(eval=id) -> Linear(H,1)
    h = jnp.dot(term, w1_ref[...], preferred_element_type=jnp.float32) + b1_ref[...]
    h = jnp.maximum(bn(h, bn1_ref), 0.0)
    # final N=1 "matmul" as a VPU multiply + lane reduce (avoids 1-column MXU op)
    mlp_out = jnp.sum(h * w2t_ref[...], axis=1, keepdims=True) + b2_ref[...]

    pred_ref[...] = jax.nn.sigmoid(lin_ref[...] + mlp_out)


def _run_kernel(shared_pk, dom_pk, lin_part, bn_sh, bn_dom, kqvw, kqvb,
                w1, b1, bn1, w2t, b2, *, tb):
    G, B_pad, _ = shared_pk.shape
    H = w1.shape[1]
    grid = (B_pad // tb,)

    batched3 = lambda i: (0, i, 0)
    batched2 = lambda i: (i, 0)
    resident = lambda i: (0, 0)

    in_specs = [
        pl.BlockSpec((G, tb, LANES), batched3),           # shared (bf16, packed)
        pl.BlockSpec((G, tb, LANES), batched3),           # domain (bf16, packed)
        pl.BlockSpec((tb, 1), batched2),                  # linear part
        pl.BlockSpec((2, EMBED_DIM), resident),           # folded BN shared
        pl.BlockSpec((2, EMBED_DIM), resident),           # folded BN domain
        pl.BlockSpec((EMBED_DIM, 3 * EMBED_DIM), resident),  # fused K|Q|V weight
        pl.BlockSpec((1, 3 * EMBED_DIM), resident),       # fused K|Q|V bias
        pl.BlockSpec((EMBED_DIM, H), resident),           # mlp w1
        pl.BlockSpec((1, H), resident),                   # mlp b1
        pl.BlockSpec((2, H), resident),                   # folded BN mlp
        pl.BlockSpec((1, H), resident),                   # mlp w2 (transposed)
        pl.BlockSpec((1, 1), resident),                   # mlp b2
    ]
    out_specs = (pl.BlockSpec((tb, 1), batched2),
                 pl.BlockSpec((tb, EMBED_DIM), batched2))

    pred, term = pl.pallas_call(
        nfm_kernel,
        grid=grid,
        out_shape=(jax.ShapeDtypeStruct((B_pad, 1), jnp.float32),
                   jax.ShapeDtypeStruct((B_pad, EMBED_DIM), jnp.float32)),
        in_specs=in_specs,
        out_specs=out_specs,
        compiler_params=pltpu.CompilerParams(
            dimension_semantics=("parallel",),
            vmem_limit_bytes=32 * 1024 * 1024),
    )(shared_pk, dom_pk, lin_part, bn_sh, bn_dom, kqvw, kqvb,
      w1, b1, bn1, w2t, b2)
    return pred, term


# ---------------------------------------------------------------------------
# Parameter initialization (deterministic, mirrors module __init__ shapes)
# ---------------------------------------------------------------------------
def _xavier(key, shape):
    fan_in, fan_out = shape[-2], shape[-1]
    bound = float(np.sqrt(6.0 / (fan_in + fan_out)))
    return jax.random.uniform(key, shape, jnp.float32, -bound, bound)


def _bn_default(c):
    # [gamma, beta, running_mean, running_var] at PyTorch init values
    return jnp.stack([jnp.ones((c,), jnp.float32),
                      jnp.zeros((c,), jnp.float32),
                      jnp.zeros((c,), jnp.float32),
                      jnp.ones((c,), jnp.float32)], axis=0)


def init_params(key, field_dims, embed_dim, mlp_dims):
    assert embed_dim == EMBED_DIM
    n_feat = int(sum(field_dims))
    E = embed_dim
    H = mlp_dims[0]
    ks = jax.random.split(key, 16)

    def linear_pair(k, d_in, d_out):
        kw_, kb_ = jax.random.split(k)
        w = _xavier(kw_, (d_in, d_out))
        b = 0.01 * jax.random.normal(kb_, (1, d_out), jnp.float32)
        return w, b

    params = {
        "offsets": jnp.asarray(
            np.concatenate([[0], np.cumsum(field_dims)[:-1]]).astype(np.int32)),
        "emb_shared": _xavier(ks[0], (n_feat, E)),
        "emb_src": _xavier(ks[1], (n_feat, E)),
        "emb_tgt": _xavier(ks[2], (n_feat, E)),
        "lin_fc": _xavier(ks[3], (n_feat, 1)),
        "lin_bias": jnp.zeros((1, 1), jnp.float32),
        "bn_shared": _bn_default(E),
        "bn_src": _bn_default(E),
        "bn_tgt": _bn_default(E),
        "src_K": linear_pair(ks[4], 16, 16),
        "src_Q": linear_pair(ks[5], 16, 16),
        "src_V": linear_pair(ks[6], 16, 16),
        "tgt_K": linear_pair(ks[7], 16, 16),
        "tgt_Q": linear_pair(ks[8], 16, 16),
        "tgt_V": linear_pair(ks[9], 16, 16),
        "mlp_w1": _xavier(ks[10], (E, H)),
        "mlp_b1": 0.01 * jax.random.normal(ks[11], (1, H), jnp.float32),
        "mlp_bn1": _bn_default(H),
        "mlp_w2": _xavier(ks[12], (H, 1)),
        "mlp_b2": 0.01 * jax.random.normal(ks[13], (1, 1), jnp.float32),
    }
    return params


def _fold_bn(bn4, eps=1e-5):
    # (4, C) [gamma, beta, mean, var] -> (2, C) [scale, shift]   (eval BN)
    gamma, beta, mean, var = bn4[0], bn4[1], bn4[2], bn4[3]
    scale = gamma * jax.lax.rsqrt(var + eps)
    shift = beta - mean * scale
    return jnp.stack([scale, shift], axis=0)


# ---------------------------------------------------------------------------
# Forward (glue: embedding gathers, lane-packing, branch on domain label)
# ---------------------------------------------------------------------------
@functools.partial(jax.jit, static_argnames=("dlabel",))
def nfm_forward(params, ids, values, seq_lengths, seq_mask, dlabel):
    # seq_lengths / seq_mask are unused by the reference forward pass.
    del seq_lengths, seq_mask
    B, S, F = ids.shape
    E = EMBED_DIM
    N = S * F

    if dlabel == "src":
        dom_tab, bn_dom4 = params["emb_src"], params["bn_src"]
        (kw, kb), (qw, qb), (vw, vb) = params["src_K"], params["src_Q"], params["src_V"]
    elif dlabel == "tgt":
        dom_tab, bn_dom4 = params["emb_tgt"], params["bn_tgt"]
        (kw, kb), (qw, qb), (vw, vb) = params["tgt_K"], params["tgt_Q"], params["tgt_V"]
    else:
        raise ValueError("dlabel must be 'src' or 'tgt'")

    # TODO(synk): embedding-table gathers stay in XLA glue (dynamic gather has
    # no clean rectangular BlockSpec); a PrefetchScalarGridSpec DMA-gather
    # version would halve HBM traffic for the big streams.
    ids_off = ids + params["offsets"][None, None, :]              # (B, S, F)
    vals = values[..., None].astype(jnp.float32)                  # (B, S, F, 1)
    shared = params["emb_shared"][ids_off] * vals                 # (B, S, F, E)
    domain = dom_tab[ids_off] * vals                               # (B, S, F, E)

    # batch tile: multiple of 16 (bf16 sublane tile), capped at TB_MAX
    TB = min(TB_MAX, _round_up(B, 16))
    B_pad = _round_up(B, TB)

    def pack(x):
        # (B, S, F, E) -> (G, B_pad, 128) bf16; 8 field-embeddings per lane row.
        x = x.reshape(B, N, E)
        n_pad = _round_up(N, FIELDS_PER_ROW)
        if n_pad != N:
            x = jnp.pad(x, ((0, 0), (0, n_pad - N), (0, 0)))
        G = n_pad // FIELDS_PER_ROW
        x = jnp.transpose(x.reshape(B, G, LANES), (1, 0, 2))      # (G, B, 128)
        if B_pad != B:
            x = jnp.pad(x, ((0, 0), (0, B_pad - B), (0, 0)))
        return x.astype(jnp.bfloat16)

    shared_pk = pack(shared)
    dom_pk = pack(domain)

    # FeaturesLinear hoisted to the wrapper: sum over 4 fields + bias -> (B, 1)
    last_off = ids[:, -1, :] + params["offsets"][None, :]          # (B, F)
    lin_vals = params["lin_fc"][last_off][..., 0]                  # (B, F)
    lin_part = jnp.sum(lin_vals, axis=1, keepdims=True) + params["lin_bias"]
    if B_pad != B:
        lin_part = jnp.pad(lin_part, ((0, B_pad - B), (0, 0)))

    # fuse K|Q|V weights, fold BN params, pre-transpose the final linear
    kqvw = jnp.concatenate([kw, qw, vw], axis=1)                   # (16, 48)
    kqvb = jnp.concatenate([kb, qb, vb], axis=1)                   # (1, 48)
    bn_sh = _fold_bn(params["bn_shared"])
    bn_dm = _fold_bn(bn_dom4)
    bn1 = _fold_bn(params["mlp_bn1"])
    w2t = params["mlp_w2"].T                                       # (1, H)

    pred, term = _run_kernel(shared_pk, dom_pk, lin_part, bn_sh, bn_dm,
                             kqvw, kqvb, params["mlp_w1"], params["mlp_b1"],
                             bn1, w2t, params["mlp_b2"], tb=TB)
    return pred[:B, 0], term[:B]                                   # (B,), (B, 16)


# ---------------------------------------------------------------------------
if __name__ == "__main__":
    key = jax.random.PRNGKey(0)
    field_dims = [10, 20, 30, 40]
    embed_dim = 16                 # must be 16 to match the Linear(16,16) heads
    mlp_dims = (32,)
    B, S, F = 2, 8, len(field_dims)

    k_par, k_ids, k_val, k_len = jax.random.split(key, 4)
    params = init_params(k_par, field_dims, embed_dim, mlp_dims)

    # per-field ids within each field's vocab size
    id_keys = jax.random.split(k_ids, F)
    ids = jnp.stack(
        [jax.random.randint(id_keys[f], (B, S), 0, field_dims[f], dtype=jnp.int32)
         for f in range(F)], axis=-1)                              # (B, S, F)
    values = jax.random.uniform(k_val, (B, S, F), jnp.float32)     # (B, S, F)
    seq_lengths = jnp.full((B, 1), S, jnp.int32)
    seq_mask = jnp.ones((B, S), jnp.float32)

    pred, term = nfm_forward(params, ids, values, seq_lengths, seq_mask, "src")
    jax.block_until_ready((pred, term))
    assert pred.shape == (B,) and term.shape == (B, embed_dim)
    assert bool(jnp.all(jnp.isfinite(pred))) and bool(jnp.all(jnp.isfinite(term)))

    pred_t, term_t = nfm_forward(params, ids, values, seq_lengths, seq_mask, "tgt")
    jax.block_until_ready((pred_t, term_t))
    assert pred_t.shape == (B,) and term_t.shape == (B, embed_dim)

    print("KERNEL_OK")
</pallas_src>

<mosaic_0001>
module attributes {stable_mosaic.version = 11 : i64} {
  func.func @nfm_kernel(%arg0: i32, %arg1: memref<4x16x128xbf16, #tpu.memory_space<vmem>>, %arg2: memref<4x16x128xbf16, #tpu.memory_space<vmem>>, %arg3: memref<16x1xf32, #tpu.memory_space<vmem>>, %arg4: memref<2x16xf32, #tpu.memory_space<vmem>>, %arg5: memref<2x16xf32, #tpu.memory_space<vmem>>, %arg6: memref<16x48xf32, #tpu.memory_space<vmem>>, %arg7: memref<1x48xf32, #tpu.memory_space<vmem>>, %arg8: memref<16x32xf32, #tpu.memory_space<vmem>>, %arg9: memref<1x32xf32, #tpu.memory_space<vmem>>, %arg10: memref<2x32xf32, #tpu.memory_space<vmem>>, %arg11: memref<1x32xf32, #tpu.memory_space<vmem>>, %arg12: memref<1x1xf32, #tpu.memory_space<vmem>>, %arg13: memref<16x1xf32, #tpu.memory_space<vmem>>, %arg14: memref<16x16xf32, #tpu.memory_space<vmem>>) attributes {dimension_semantics = [#tpu.dimension_semantics<parallel>], iteration_bounds = array<i64: 1>, scalar_prefetch = 0 : i64, scratch_operands = 0 : i64, tpu.core_type = #tpu.core_type<tc>, window_params = [{transform_indices = @transform_0, window_bounds = array<i64: 4, 16, 128>}, {transform_indices = @transform_1, window_bounds = array<i64: 4, 16, 128>}, {transform_indices = @transform_2, window_bounds = array<i64: 16, 1>}, {pipeline_mode = #tpu.pipeline_mode<synchronous>, transform_indices = @transform_3, window_bounds = array<i64: 2, 16>}, {pipeline_mode = #tpu.pipeline_mode<synchronous>, transform_indices = @transform_4, window_bounds = array<i64: 2, 16>}, {pipeline_mode = #tpu.pipeline_mode<synchronous>, transform_indices = @transform_5, window_bounds = array<i64: 16, 48>}, {pipeline_mode = #tpu.pipeline_mode<synchronous>, transform_indices = @transform_6, window_bounds = array<i64: 1, 48>}, {pipeline_mode = #tpu.pipeline_mode<synchronous>, transform_indices = @transform_7, window_bounds = array<i64: 16, 32>}, {pipeline_mode = #tpu.pipeline_mode<synchronous>, transform_indices = @transform_8, window_bounds = array<i64: 1, 32>}, {pipeline_mode = #tpu.pipeline_mode<synchronous>, transform_indices = @transform_9, window_bounds = array<i64: 2, 32>}, {pipeline_mode = #tpu.pipeline_mode<synchronous>, transform_indices = @transform_10, window_bounds = array<i64: 1, 32>}, {pipeline_mode = #tpu.pipeline_mode<synchronous>, transform_indices = @transform_11, window_bounds = array<i64: 1, 1>}, {transform_indices = @transform_12, window_bounds = array<i64: 16, 1>}, {transform_indices = @transform_13, window_bounds = array<i64: 16, 16>}]} {
    %c0 = arith.constant 0 : index
    %c0_0 = arith.constant 0 : index
    %c0_1 = arith.constant 0 : index
    %0 = vector.load %arg1[%c0, %c0_0, %c0_1] : memref<4x16x128xbf16, #tpu.memory_space<vmem>>, vector<4x16x128xbf16>
    %1 = arith.extf %0 : vector<4x16x128xbf16> to vector<4x16x128xf32>
    %cst = arith.constant dense<0.000000e+00> : vector<16x128xf32>
    %2 = vector.multi_reduction <add>, %1, %cst [0] : vector<4x16x128xf32> to vector<16x128xf32>
    %c64_i32 = arith.constant 64 : i32
    %3 = tpu.dynamic_rotate %2 by %c64_i32 dim 1 : vector<16x128xf32>, i32 -> vector<16x128xf32>
    %4 = arith.addf %2, %3 : vector<16x128xf32>
    %c32_i32 = arith.constant 32 : i32
    %5 = tpu.dynamic_rotate %4 by %c32_i32 dim 1 : vector<16x128xf32>, i32 -> vector<16x128xf32>
    %6 = arith.addf %4, %5 : vector<16x128xf32>
    %c16_i32 = arith.constant 16 : i32
    %7 = tpu.dynamic_rotate %6 by %c16_i32 dim 1 : vector<16x128xf32>, i32 -> vector<16x128xf32>
    %8 = arith.addf %6, %7 : vector<16x128xf32>
    %9 = vector.extract_strided_slice %8 {offsets = [0, 0], sizes = [16, 16], strides = [1, 1]} : vector<16x128xf32> to vector<16x16xf32>
    %10 = arith.mulf %1, %1 : vector<4x16x128xf32>
    %cst_2 = arith.constant dense<0.000000e+00> : vector<16x128xf32>
    %11 = vector.multi_reduction <add>, %10, %cst_2 [0] : vector<4x16x128xf32> to vector<16x128xf32>
    %c64_i32_3 = arith.constant 64 : i32
    %12 = tpu.dynamic_rotate %11 by %c64_i32_3 dim 1 : vector<16x128xf32>, i32 -> vector<16x128xf32>
    %13 = arith.addf %11, %12 : vector<16x128xf32>
    %c32_i32_4 = arith.constant 32 : i32
    %14 = tpu.dynamic_rotate %13 by %c32_i32_4 dim 1 : vector<16x128xf32>, i32 -> vector<16x128xf32>
    %15 = arith.addf %13, %14 : vector<16x128xf32>
    %c16_i32_5 = arith.constant 16 : i32
    %16 = tpu.dynamic_rotate %15 by %c16_i32_5 dim 1 : vector<16x128xf32>, i32 -> vector<16x128xf32>
    %17 = arith.addf %15, %16 : vector<16x128xf32>
    %18 = vector.extract_strided_slice %17 {offsets = [0, 0], sizes = [16, 16], strides = [1, 1]} : vector<16x128xf32> to vector<16x16xf32>
    %19 = arith.mulf %9, %9 : vector<16x16xf32>
    %20 = arith.subf %19, %18 : vector<16x16xf32>
    %cst_6 = arith.constant 5.000000e-01 : f32
    %21 = vector.broadcast %cst_6 : f32 to vector<16x16xf32>
    %22 = arith.mulf %21, %20 : vector<16x16xf32>
    %c0_7 = arith.constant 0 : index
    %c0_8 = arith.constant 0 : index
    %23 = vector.load %arg4[%c0_7, %c0_8] : memref<2x16xf32, #tpu.memory_space<vmem>>, vector<2x16xf32>
    %24 = vector.extract_strided_slice %23 {offsets = [0, 0], sizes = [1, 16], strides = [1, 1]} : vector<2x16xf32> to vector<1x16xf32>
    %25 = vector.broadcast %24 : vector<1x16xf32> to vector<16x16xf32>
    %26 = arith.mulf %22, %25 : vector<16x16xf32>
    %27 = vector.extract_strided_slice %23 {offsets = [1, 0], sizes = [1, 16], strides = [1, 1]} : vector<2x16xf32> to vector<1x16xf32>
    %28 = vector.broadcast %27 : vector<1x16xf32> to vector<16x16xf32>
    %29 = arith.addf %26, %28 : vector<16x16xf32>
    %c0_9 = arith.constant 0 : index
    %c0_10 = arith.constant 0 : index
    %c0_11 = arith.constant 0 : index
    %30 = vector.load %arg2[%c0_9, %c0_10, %c0_11] : memref<4x16x128xbf16, #tpu.memory_space<vmem>>, vector<4x16x128xbf16>
    %31 = arith.extf %30 : vector<4x16x128xbf16> to vector<4x16x128xf32>
    %cst_12 = arith.constant dense<0.000000e+00> : vector<16x128xf32>
    %32 = vector.multi_reduction <add>, %31, %cst_12 [0] : vector<4x16x128xf32> to vector<16x128xf32>
    %c64_i32_13 = arith.constant 64 : i32
    %33 = tpu.dynamic_rotate %32 by %c64_i32_13 dim 1 : vector<16x128xf32>, i32 -> vector<16x128xf32>
    %34 = arith.addf %32, %33 : vector<16x128xf32>
    %c32_i32_14 = arith.constant 32 : i32
    %35 = tpu.dynamic_rotate %34 by %c32_i32_14 dim 1 : vector<16x128xf32>, i32 -> vector<16x128xf32>
    %36 = arith.addf %34, %35 : vector<16x128xf32>
    %c16_i32_15 = arith.constant 16 : i32
    %37 = tpu.dynamic_rotate %36 by %c16_i32_15 dim 1 : vector<16x128xf32>, i32 -> vector<16x128xf32>
    %38 = arith.addf %36, %37 : vector<16x128xf32>
    %39 = vector.extract_strided_slice %38 {offsets = [0, 0], sizes = [16, 16], strides = [1, 1]} : vector<16x128xf32> to vector<16x16xf32>
    %40 = arith.mulf %31, %31 : vector<4x16x128xf32>
    %cst_16 = arith.constant dense<0.000000e+00> : vector<16x128xf32>
    %41 = vector.multi_reduction <add>, %40, %cst_16 [0] : vector<4x16x128xf32> to vector<16x128xf32>
    %c64_i32_17 = arith.constant 64 : i32
    %42 = tpu.dynamic_rotate %41 by %c64_i32_17 dim 1 : vector<16x128xf32>, i32 -> vector<16x128xf32>
    %43 = arith.addf %41, %42 : vector<16x128xf32>
    %c32_i32_18 = arith.constant 32 : i32
    %44 = tpu.dynamic_rotate %43 by %c32_i32_18 dim 1 : vector<16x128xf32>, i32 -> vector<16x128xf32>
    %45 = arith.addf %43, %44 : vector<16x128xf32>
    %c16_i32_19 = arith.constant 16 : i32
    %46 = tpu.dynamic_rotate %45 by %c16_i32_19 dim 1 : vector<16x128xf32>, i32 -> vector<16x128xf32>
    %47 = arith.addf %45, %46 : vector<16x128xf32>
    %48 = vector.extract_strided_slice %47 {offsets = [0, 0], sizes = [16, 16], strides = [1, 1]} : vector<16x128xf32> to vector<16x16xf32>
    %49 = arith.mulf %39, %39 : vector<16x16xf32>
    %50 = arith.subf %49, %48 : vector<16x16xf32>
    %cst_20 = arith.constant 5.000000e-01 : f32
    %51 = vector.broadcast %cst_20 : f32 to vector<16x16xf32>
    %52 = arith.mulf %51, %50 : vector<16x16xf32>
    %c0_21 = arith.constant 0 : index
    %c0_22 = arith.constant 0 : index
    %53 = vector.load %arg5[%c0_21, %c0_22] : memref<2x16xf32, #tpu.memory_space<vmem>>, vector<2x16xf32>
    %54 = vector.extract_strided_slice %53 {offsets = [0, 0], sizes = [1, 16], strides = [1, 1]} : vector<2x16xf32> to vector<1x16xf32>
    %55 = vector.broadcast %54 : vector<1x16xf32> to vector<16x16xf32>
    %56 = arith.mulf %52, %55 : vector<16x16xf32>
    %57 = vector.extract_strided_slice %53 {offsets = [1, 0], sizes = [1, 16], strides = [1, 1]} : vector<2x16xf32> to vector<1x16xf32>
    %58 = vector.broadcast %57 : vector<1x16xf32> to vector<16x16xf32>
    %59 = arith.addf %56, %58 : vector<16x16xf32>
    %60 = tpu.concatenate %59, %29 in 0 : vector<16x16xf32>, vector<16x16xf32> -> vector<32x16xf32>
    %c0_23 = arith.constant 0 : index
    %c0_24 = arith.constant 0 : index
    %61 = vector.load %arg6[%c0_23, %c0_24] : memref<16x48xf32, #tpu.memory_space<vmem>>, vector<16x48xf32>
    %cst_25 = arith.constant dense<0.000000e+00> : vector<32x48xf32>
    %62 = tpu.matmul %60, %61, %cst_25 {dimension_numbers = #tpu.dot_dimension_numbers<[1], [0], [0], [1], [0, 0, 1, 1], [], []>} : vector<32x16xf32>, vector<16x48xf32>, vector<32x48xf32> -> vector<32x48xf32>
    %c0_26 = arith.constant 0 : index
    %c0_27 = arith.constant 0 : index
    %63 = vector.load %arg7[%c0_26, %c0_27] : memref<1x48xf32, #tpu.memory_space<vmem>>, vector<1x48xf32>
    %64 = vector.broadcast %63 : vector<1x48xf32> to vector<32x48xf32>
    %65 = arith.addf %62, %64 : vector<32x48xf32>
    %66 = vector.extract_strided_slice %65 {offsets = [0, 0], sizes = [16, 16], strides = [1, 1]} : vector<32x48xf32> to vector<16x16xf32>
    %67 = vector.extract_strided_slice %65 {offsets = [0, 16], sizes = [16, 16], strides = [1, 1]} : vector<32x48xf32> to vector<16x16xf32>
    %68 = vector.extract_strided_slice %65 {offsets = [0, 32], sizes = [16, 16], strides = [1, 1]} : vector<32x48xf32> to vector<16x16xf32>
    %69 = vector.extract_strided_slice %65 {offsets = [16, 0], sizes = [16, 16], strides = [1, 1]} : vector<32x48xf32> to vector<16x16xf32>
    %70 = vector.extract_strided_slice %65 {offsets = [16, 16], sizes = [16, 16], strides = [1, 1]} : vector<32x48xf32> to vector<16x16xf32>
    %71 = vector.extract_strided_slice %65 {offsets = [16, 32], sizes = [16, 16], strides = [1, 1]} : vector<32x48xf32> to vector<16x16xf32>
    %72 = arith.mulf %66, %67 : vector<16x16xf32>
    %cst_28 = arith.constant dense<0.000000e+00> : vector<16xf32>
    %73 = vector.multi_reduction <add>, %72, %cst_28 [1] : vector<16x16xf32> to vector<16xf32>
    %74 = vector.shape_cast %73 : vector<16xf32> to vector<16x1xf32>
    %cst_29 = arith.constant 2.500000e-01 : f32
    %75 = vector.broadcast %cst_29 : f32 to vector<16x1xf32>
    %76 = arith.mulf %74, %75 : vector<16x1xf32>
    %77 = arith.mulf %69, %70 : vector<16x16xf32>
    %cst_30 = arith.constant dense<0.000000e+00> : vector<16xf32>
    %78 = vector.multi_reduction <add>, %77, %cst_30 [1] : vector<16x16xf32> to vector<16xf32>
    %79 = vector.shape_cast %78 : vector<16xf32> to vector<16x1xf32>
    %cst_31 = arith.constant 2.500000e-01 : f32
    %80 = vector.broadcast %cst_31 : f32 to vector<16x1xf32>
    %81 = arith.mulf %79, %80 : vector<16x1xf32>
    %82 = arith.maximumf %76, %81 : vector<16x1xf32>
    %83 = arith.subf %76, %82 : vector<16x1xf32>
    %84 = math.exp %83 : vector<16x1xf32>
    %85 = arith.subf %81, %82 : vector<16x1xf32>
    %86 = math.exp %85 : vector<16x1xf32>
    %87 = arith.addf %84, %86 : vector<16x1xf32>
    %88 = tpu.reciprocal %87 {approx = true} : vector<16x1xf32> -> vector<16x1xf32>
    %89 = arith.mulf %84, %88 : vector<16x1xf32>
    %90 = vector.broadcast %89 : vector<16x1xf32> to vector<16x16xf32>
    %91 = arith.mulf %90, %68 : vector<16x16xf32>
    %92 = arith.mulf %86, %88 : vector<16x1xf32>
    %93 = vector.broadcast %92 : vector<16x1xf32> to vector<16x16xf32>
    %94 = arith.mulf %93, %71 : vector<16x16xf32>
    %95 = arith.addf %91, %94 : vector<16x16xf32>
    %c0_32 = arith.constant 0 : index
    %c0_33 = arith.constant 0 : index
    %96 = vector.load %arg14[%c0_32, %c0_33] : memref<16x16xf32, #tpu.memory_space<vmem>>, vector<16x16xf32>
    tpu.vector_store %arg14[%c0_32, %c0_33], %95 {strides = array<i32>} : memref<16x16xf32, #tpu.memory_space<vmem>>, vector<16x16xf32>,
    %c0_34 = arith.constant 0 : index
    %c0_35 = arith.constant 0 : index
    %97 = vector.load %arg8[%c0_34, %c0_35] : memref<16x32xf32, #tpu.memory_space<vmem>>, vector<16x32xf32>
    %cst_36 = arith.constant dense<0.000000e+00> : vector<16x32xf32>
    %98 = tpu.matmul %95, %97, %cst_36 {dimension_numbers = #tpu.dot_dimension_numbers<[1], [0], [0], [1], [0, 0, 1, 1], [], []>} : vector<16x16xf32>, vector<16x32xf32>, vector<16x32xf32> -> vector<16x32xf32>
    %c0_37 = arith.constant 0 : index
    %c0_38 = arith.constant 0 : index
    %99 = vector.load %arg9[%c0_37, %c0_38] : memref<1x32xf32, #tpu.memory_space<vmem>>, vector<1x32xf32>
    %100 = vector.broadcast %99 : vector<1x32xf32> to vector<16x32xf32>
    %101 = arith.addf %98, %100 : vector<16x32xf32>
    %c0_39 = arith.constant 0 : index
    %c0_40 = arith.constant 0 : index
    %102 = vector.load %arg10[%c0_39, %c0_40] : memref<2x32xf32, #tpu.memory_space<vmem>>, vector<2x32xf32>
    %103 = vector.extract_strided_slice %102 {offsets = [0, 0], sizes = [1, 32], strides = [1, 1]} : vector<2x32xf32> to vector<1x32xf32>
    %104 = vector.broadcast %103 : vector<1x32xf32> to vector<16x32xf32>
    %105 = arith.mulf %101, %104 : vector<16x32xf32>
    %106 = vector.extract_strided_slice %102 {offsets = [1, 0], sizes = [1, 32], strides = [1, 1]} : vector<2x32xf32> to vector<1x32xf32>
    %107 = vector.broadcast %106 : vector<1x32xf32> to vector<16x32xf32>
    %108 = arith.addf %105, %107 : vector<16x32xf32>
    %cst_41 = arith.constant 0.000000e+00 : f32
    %109 = vector.broadcast %cst_41 : f32 to vector<16x32xf32>
    %110 = arith.maximumf %108, %109 : vector<16x32xf32>
    %c0_42 = arith.constant 0 : index
    %c0_43 = arith.constant 0 : index
    %111 = vector.load %arg11[%c0_42, %c0_43] : memref<1x32xf32, #tpu.memory_space<vmem>>, vector<1x32xf32>
    %112 = vector.broadcast %111 : vector<1x32xf32> to vector<16x32xf32>
    %113 = arith.mulf %110, %112 : vector<16x32xf32>
    %cst_44 = arith.constant dense<0.000000e+00> : vector<16xf32>
    %114 = vector.multi_reduction <add>, %113, %cst_44 [1] : vector<16x32xf32> to vector<16xf32>
    %115 = vector.shape_cast %114 : vector<16xf32> to vector<16x1xf32>
    %c0_45 = arith.constant 0 : index
    %c0_46 = arith.constant 0 : index
    %116 = vector.load %arg12[%c0_45, %c0_46] : memref<1x1xf32, #tpu.memory_space<vmem>>, vector<1x1xf32>
    %117 = vector.broadcast %116 : vector<1x1xf32> to vector<16x1xf32>
    %118 = arith.addf %115, %117 : vector<16x1xf32>
    %c0_47 = arith.constant 0 : index
    %c0_48 = arith.constant 0 : index
    %119 = vector.load %arg3[%c0_47, %c0_48] : memref<16x1xf32, #tpu.memory_space<vmem>>, vector<16x1xf32>
    %120 = arith.addf %119, %118 : vector<16x1xf32>
    %121 = arith.negf %120 : vector<16x1xf32>
    %122 = math.exp %121 : vector<16x1xf32>
    %cst_49 = arith.constant 1.000000e+00 : f32
    %123 = vector.broadcast %cst_49 : f32 to vector<16x1xf32>
    %124 = arith.addf %123, %122 : vector<16x1xf32>
    %125 = arith.divf %123, %124 : vector<16x1xf32>
    %c0_50 = arith.constant 0 : index
    %c0_51 = arith.constant 0 : index
    %126 = vector.load %arg13[%c0_50, %c0_51] : memref<16x1xf32, #tpu.memory_space<vmem>>, vector<16x1xf32>
    tpu.vector_store %arg13[%c0_50, %c0_51], %125 {strides = array<i32>} : memref<16x1xf32, #tpu.memory_space<vmem>>, vector<16x1xf32>,
    return
  }
  func.func @transform_0(%arg0: i32) -> (i32, i32, i32) {
    %c0_i32 = arith.constant 0 : i32
    %c0_i32_0 = arith.constant 0 : i32
    %c0_i32_1 = arith.constant 0 : i32
    return %c0_i32, %arg0, %c0_i32_0 : i32, i32, i32
  }
  func.func @transform_1(%arg0: i32) -> (i32, i32, i32) {
    %c0_i32 = arith.constant 0 : i32
    %c0_i32_0 = arith.constant 0 : i32
    %c0_i32_1 = arith.constant 0 : i32
    return %c0_i32, %arg0, %c0_i32_0 : i32, i32, i32
  }
  func.func @transform_2(%arg0: i32) -> (i32, i32) {
    %c0_i32 = arith.constant 0 : i32
    %c0_i32_0 = arith.constant 0 : i32
    return %arg0, %c0_i32 : i32, i32
  }
  func.func @transform_3(%arg0: i32) -> (i32, i32) {
    %c0_i32 = arith.constant 0 : i32
    %c0_i32_0 = arith.constant 0 : i32
    %c0_i32_1 = arith.constant 0 : i32
    return %c0_i32, %c0_i32_0 : i32, i32
  }
  func.func @transform_4(%arg0: i32) -> (i32, i32) {
    %c0_i32 = arith.constant 0 : i32
    %c0_i32_0 = arith.constant 0 : i32
    %c0_i32_1 = arith.constant 0 : i32
    return %c0_i32, %c0_i32_0 : i32, i32
  }
  func.func @transform_5(%arg0: i32) -> (i32, i32) {
    %c0_i32 = arith.constant 0 : i32
    %c0_i32_0 = arith.constant 0 : i32
    %c0_i32_1 = arith.constant 0 : i32
    return %c0_i32, %c0_i32_0 : i32, i32
  }
  func.func @transform_6(%arg0: i32) -> (i32, i32) {
    %c0_i32 = arith.constant 0 : i32
    %c0_i32_0 = arith.constant 0 : i32
    %c0_i32_1 = arith.constant 0 : i32
    return %c0_i32, %c0_i32_0 : i32, i32
  }
  func.func @transform_7(%arg0: i32) -> (i32, i32) {
    %c0_i32 = arith.constant 0 : i32
    %c0_i32_0 = arith.constant 0 : i32
    %c0_i32_1 = arith.constant 0 : i32
    return %c0_i32, %c0_i32_0 : i32, i32
  }
  func.func @transform_8(%arg0: i32) -> (i32, i32) {
    %c0_i32 = arith.constant 0 : i32
    %c0_i32_0 = arith.constant 0 : i32
    %c0_i32_1 = arith.constant 0 : i32
    return %c0_i32, %c0_i32_0 : i32, i32
  }
  func.func @transform_9(%arg0: i32) -> (i32, i32) {
    %c0_i32 = arith.constant 0 : i32
    %c0_i32_0 = arith.constant 0 : i32
    %c0_i32_1 = arith.constant 0 : i32
    return %c0_i32, %c0_i32_0 : i32, i32
  }
  func.func @transform_10(%arg0: i32) -> (i32, i32) {
    %c0_i32 = arith.constant 0 : i32
    %c0_i32_0 = arith.constant 0 : i32
    %c0_i32_1 = arith.constant 0 : i32
    return %c0_i32, %c0_i32_0 : i32, i32
  }
  func.func @transform_11(%arg0: i32) -> (i32, i32) {
    %c0_i32 = arith.constant 0 : i32
    %c0_i32_0 = arith.constant 0 : i32
    %c0_i32_1 = arith.constant 0 : i32
    return %c0_i32, %c0_i32_0 : i32, i32
  }
  func.func @transform_12(%arg0: i32) -> (i32, i32) {
    %c0_i32 = arith.constant 0 : i32
    %c0_i32_0 = arith.constant 0 : i32
    return %arg0, %c0_i32 : i32, i32
  }
  func.func @transform_13(%arg0: i32) -> (i32, i32) {
    %c0_i32 = arith.constant 0 : i32
    %c0_i32_0 = arith.constant 0 : i32
    return %arg0, %c0_i32 : i32, i32
  }
}

</mosaic_0001>

<bundles_post_ra>
// kernel: nfm_forward.1
= control target key start
LH: loop header
LB: loop body
LE: loop exit
PB: predicated region body
PF: predicated region fallthrough
CT: control target
= control target key end

     0   :  { %s713_s23 = smov 64   ;;  %v714_v38 = vmov 1935823168   ;;  %v683_v41 = vlaneseq  ;;  %s716_s24 = smov 16   ;;  %vm236_vm0 = vcmask 130048   ;;  %vm520_vm1 = vcmask 261120   ;;  %s914_s1 = inlined_call_operand.vmem [shape: bf16[4,16,128], index: 1, kind: input, shape index: {}]   ;;  %s915_s0 = inlined_call_operand.vmem [shape: bf16[4,16,128], index: 0, kind: input, shape index: {}]   ;;  %s916_s5 = inlined_call_operand.vmem [shape: f32[16,48], index: 5, kind: input, shape index: {}]   ;;  %s917_s4 = inlined_call_operand.vmem [shape: f32[2,16], index: 4, kind: input, shape index: {}]   ;;  %s918_s3 = inlined_call_operand.vmem [shape: f32[2,16], index: 3, kind: input, shape index: {}]   ;;  %s919_s6 = inlined_call_operand.vmem [shape: f32[1,48], index: 6, kind: input, shape index: {}]   ;;  %s920_s7 = inlined_call_operand.vmem [shape: f32[16,32], index: 7, kind: input, shape index: {}]   ;;  %s921_s13 = inlined_call_operand.vmem [shape: f32[16,16], index: 13, kind: output, shape index: {1}]   ;;  %s922_s11 = inlined_call_operand.<no memory space> [shape: f32[1,1], index: 11, kind: input, shape index: {}]   ;;  %s923_s9 = inlined_call_operand.vmem [shape: f32[2,32], index: 9, kind: input, shape index: {}]   ;;  %s924_s8 = inlined_call_operand.vmem [shape: f32[1,32], index: 8, kind: input, shape index: {}]   ;;  %s925_s10 = inlined_call_operand.vmem [shape: f32[1,32], index: 10, kind: input, shape index: {}]   ;;  %s926_s2 = inlined_call_operand.vmem [shape: f32[16,1], index: 2, kind: input, shape index: {}]   ;;  %s927_s12 = inlined_call_operand.vmem [shape: f32[16,1], index: 12, kind: output, shape index: {0}]  }
   0x1   :  { %v592_v0 = vld [vmem:[%s914_s1] sm:$0xff]   ;;  %v610_v1 = vld [vmem:[%s914_s1 + $0x8] sm:$0xff]   ;;  %v611_v2 = vld [vmem:[%s914_s1 + $0x10] sm:$0xff]   ;;  %v681_v39 = vunpack.c.l.s4 %v714_v38  ;;  %s717_s15 = smov 112   ;;  %s718_s19 = smov 96   ;;  %vm552_vm2 = vcmask 7168  }
   0x2   :  { %v593_v3 = vunpack.c.l.bf16 %v592_v0  ;;  %v594_v4 = vunpack.c.h.bf16 %v592_v0  ;;  %v597_v5 = vunpack.c.l.bf16 %v610_v1  ;;  %v598_v6 = vunpack.c.h.bf16 %v610_v1  ;;  %v612_v7 = vld [vmem:[%s914_s1 + $0x18] sm:$0xff]   ;;  %v576_v8 = vld [vmem:[%s915_s0] sm:$0xff]   ;;  %v607_v11 = vld [vmem:[%s915_s0 + $0x8] sm:$0xff]  }
   0x3   :  { %v601_v9 = vunpack.c.l.bf16 %v611_v2  ;;  %v602_v10 = vunpack.c.h.bf16 %v611_v2  ;;  %v605_v12 = vunpack.c.l.bf16 %v612_v7  ;;  %v606_v13 = vunpack.c.h.bf16 %v612_v7  ;;  %v608_v16 = vld [vmem:[%s915_s0 + $0x10] sm:$0xff]   ;;  %v609_v18 = vld [vmem:[%s915_s0 + $0x18] sm:$0xff]   ;;  %s715_s0 = smov 32  }
   0x4   :  { %v152_v14 = vadd.f32 %v597_v5, %v593_v3  ;;  %v155_v15 = vadd.f32 %v598_v6, %v594_v4  ;;  %v578_v17 = vunpack.c.h.bf16 %v576_v8  ;;  %v582_v21 = vunpack.c.h.bf16 %v607_v11 }
   0x5   :  { %v581_v22 = vunpack.c.l.bf16 %v607_v11  ;;  %v585_v23 = vunpack.c.l.bf16 %v608_v16  ;;  %v586_v24 = vunpack.c.h.bf16 %v608_v16  ;;  %v589_v25 = vunpack.c.l.bf16 %v609_v18 }
   0x6   :  { %v153_v19 = vadd.f32 %v601_v9, %v152_v14  ;;  %v156_v20 = vadd.f32 %v602_v10, %v155_v15  ;;  %v590_v27 = vunpack.c.h.bf16 %v609_v18  ;;  %v64_v28 = vadd.f32 %v582_v21, %v578_v17  ;;  %v227_v10 = vld [vmem:[%s916_s5] sm:$0xff] }
   0x7   :  { %v577_v30 = vunpack.c.l.bf16 %v576_v8  ;;  %673 = vmul.bf16.f32.vacc0 %v592_v0, %v592_v0  ;;  %v682_v40 = vunpack.c.0.s8 %v681_v39  ;;  %v814_v42 = vshrl.u32 %v683_v41, 7 }
   0x8   :  { %v154_v26 = vadd.f32 %v605_v12, %v153_v19  ;;  %v157_v29 = vadd.f32 %v606_v13, %v156_v20  ;;  %674 = vmac.bf16.f32.vacc0 %v610_v1, %v610_v1  ;;  %v65_v31 = vadd.f32 %v586_v24, %v64_v28 }
   0x9   :  { %675 = vmac.bf16.f32.vacc0 %v611_v2, %v611_v2  ;;  %v61_v32 = vadd.f32 %v581_v22, %v577_v30  ;;  %v685_v43 = vsub.s32 %v682_v40, %v814_v42  ;;  %693 = vmul.bf16.f32.vacc1 %v576_v8, %v576_v8 }
   0xa   :  { %158 = vrot.lane.b32.xlu0 %v154_v26, %s713_s23  ;;  %v66_v33 = vadd.f32 %v590_v27, %v65_v31  ;;  %676 = vmac.bf16.f32.vacc0 %v612_v7, %v612_v7  ;;  %694 = vmac.bf16.f32.vacc1 %v607_v11, %v607_v11  ;;  %v228_v11 = vld [vmem:[%s916_s5 + $0x8] sm:$0xff]  ;;  %v831_v31 = vsub.s32 0, %v814_v42 }
   0xb   :  { %v62_v46 = vadd.f32 %v585_v23, %v61_v32  ;;  %695 = vmac.bf16.f32.vacc1 %v608_v16, %v608_v16  ;;  %v640_v12 = vpack.c.bf16 %v228_v11, %v227_v10 }
   0xc   :  { %v677_v34 = vmovacc.add.low.vacc0  ;;  %69 = vrot.lane.b32.xlu1 %v66_v33, %s713_s23  ;;  %696 = vmac.bf16.f32.vacc1 %v609_v18, %v609_v18 }
   0xd   :  { %v678_v35 = vmovacc.add.high.vacc0  ;;  %v63_v47 = vadd.f32 %v589_v25, %v62_v46  ;;  %641 = vmatprep.subr.bf16.mxu0 %v640_v12 }
   0xe   :  { %160 = vrot.lane.b32.xlu0 %v157_v29, %s713_s23  ;;  %v697_v48 = vmovacc.add.low.vacc1  ;;  %643 = vmatpush3.bf16.msra.mxu0 %v640_v12 }
   0xf   :  { %v679_v36 = vcombine.low %v677_v34, %v678_v35  ;;  %v680_v37 = vcombine.high %v677_v34, %v678_v35  ;;  %v698_v49 = vmovacc.add.high.vacc1 }
  0x11   :  { %v686_v44 = vrot.slane %v679_v36, %v685_v43  ;;  %v692_v45 = vrot.slane %v680_v37, %v685_v43  ;;  %v699_v50 = vcombine.low %v697_v48, %v698_v49  ;;  %v700_v51 = vcombine.high %v697_v48, %v698_v49  ;;  %v214_v37 = vld [vmem:[%s917_s4] sm:$0x3] }
  0x12   :  { %67 = vrot.lane.b32.xlu0 %v63_v47, %s713_s23  ;;  %v834_v36 = vsub.s32 1, %v814_v42  ;;  %v218_v46 = vrot.slane %v214_v37, %v831_v31 }
  0x13   :  { %190 = vrot.lane.b32.xlu1 %v686_v44, %s713_s23  ;;  %v706_v52 = vrot.slane %v699_v50, %v685_v43  ;;  %v712_v53 = vrot.slane %v700_v51, %v685_v43 }
  0x14   :  { %v224_v50 = vrot.slane %v214_v37, %v834_v36 }
  0x16   :  { %99 = vrot.lane.b32.xlu0 %v706_v52, %s713_s23 }
  0x17   :  { %192 = vrot.lane.b32.xlu1 %v692_v45, %s713_s23 }
  0x1b   :  { %101 = vrot.lane.b32.xlu1 %v712_v53, %s713_s23 }
  0x7c   :  { %v159_v54 = vpop.permute.xlu0 %158 }
  0x7d   :  { %v162_v55 = vadd.f32 %v159_v54, %v154_v26 }
  0x7e   :  { %v70_v57 = vpop.permute.xlu1 %69 }
  0x7f   :  { %164 = vrot.lane.b32.xlu0 %v162_v55, %s715_s0  ;;  %v72_v61 = vadd.f32 %v70_v57, %v66_v33 }
  0x80   :  { %v161_v56 = vpop.permute.xlu0 %160 }
  0x81   :  { %v163_v58 = vadd.f32 %v161_v56, %v157_v29 }
  0x83   :  { %166 = vrot.lane.b32.xlu1 %v163_v58, %s715_s0 }
  0x84   :  { %v68_v60 = vpop.permute.xlu0 %67 }
  0x85   :  { %v191_v59 = vpop.permute.xlu1 %190  ;;  %v71_v62 = vadd.f32 %v68_v60, %v63_v47 }
  0x86   :  { %v194_v1 = vadd.f32 %v686_v44, %v191_v59 }
  0x87   :  { %75 = vrot.lane.b32.xlu1 %v72_v61, %s715_s0  ;;  %73 = vrot.lane.b32.xlu0 %v71_v62, %s715_s0 }
  0x88   :  { %v100_v0 = vpop.permute.xlu0 %99 }
  0x89   :  { %v193_v63 = vpop.permute.xlu1 %192  ;;  %v103_v3 = vadd.f32 %v706_v52, %v100_v0 }
  0x8a   :  { %v195_v2 = vadd.f32 %v692_v45, %v193_v63  ;;  %v123_v45 = vld [vmem:[%s918_s3] sm:$0x3] }
  0x8b   :  { %196 = vrot.lane.b32.xlu0 %v194_v1, %s715_s0  ;;  %v133_v60 = vrot.slane %v123_v45, %v834_v36 }
  0x8c   :  { %198 = vrot.lane.b32.xlu1 %v195_v2, %s715_s0 }
  0x8d   :  { %v102_v4 = vpop.permute.xlu1 %101 }
  0x8e   :  { %v104_v5 = vadd.f32 %v712_v53, %v102_v4 }
  0x8f   :  { %105 = vrot.lane.b32.xlu0 %v103_v3, %s715_s0 }
  0x90   :  { %107 = vrot.lane.b32.xlu1 %v104_v5, %s715_s0 }
  0xf1   :  { %v165_v6 = vpop.permute.xlu0 %164 }
  0xf2   :  { %v168_v7 = vadd.f32 %v165_v6, %v162_v55  ;;  %v127_v55 = vrot.slane %v123_v45, %v831_v31 }
  0xf4   :  { %170 = vrot.lane.b32.xlu0 %v168_v7, %s716_s24 }
  0xf5   :  { %v167_v8 = vpop.permute.xlu1 %166 }
  0xf6   :  { %v169_v9 = vadd.f32 %v167_v8, %v163_v58 }
  0xf8   :  { %172 = vrot.lane.b32.xlu1 %v169_v9, %s716_s24 }
  0xf9   :  { %v76_v13 = vpop.permute.xlu1 %75  ;;  %v74_v14 = vpop.permute.xlu0 %73 }
  0xfa   :  { %v78_v15 = vadd.f32 %v76_v13, %v72_v61  ;;  %v77_v16 = vadd.f32 %v74_v14, %v71_v62 }
  0xfc   :  { %81 = vrot.lane.b32.xlu1 %v78_v15, %s716_s24  ;;  %79 = vrot.lane.b32.xlu0 %v77_v16, %s716_s24 }
  0xfd   :  { %v197_v18 = vpop.permute.xlu0 %196 }
  0xfe   :  { %v199_v17 = vpop.permute.xlu1 %198  ;;  %v200_v20 = vadd.f32 %v197_v18, %v194_v1 }
  0xff   :  { %v201_v19 = vadd.f32 %v199_v17, %v195_v2 }
 0x100   :  { %202 = vrot.lane.b32.xlu0 %v200_v20, %s716_s24 }
 0x101   :  { %204 = vrot.lane.b32.xlu1 %v201_v19, %s716_s24  ;;  %v106_v22 = vpop.permute.xlu0 %105 }
 0x102   :  { %v108_v21 = vpop.permute.xlu1 %107  ;;  %v109_v24 = vadd.f32 %v106_v22, %v103_v3 }
 0x103   :  { %v110_v23 = vadd.f32 %v108_v21, %v104_v5  ;;  %v563_v5 = vld [vmem:[%s919_s6] ss:$0 sm:$0xff] }
 0x104   :  { %111 = vrot.lane.b32.xlu0 %v109_v24, %s716_s24 }
 0x105   :  { %113 = vrot.lane.b32.xlu1 %v110_v23, %s716_s24 }
 0x166   :  { %v171_v25 = vpop.permute.xlu0 %170 }
 0x167   :  { %v174_v29 = vadd.f32 %v171_v25, %v168_v7 }
 0x169   :  { %v208_v38 = vmul.f32 %v174_v29, %v174_v29 }
 0x16a   :  { %v173_v26 = vpop.permute.xlu1 %172 }
 0x16b   :  { %v175_v30 = vadd.f32 %v173_v26, %v169_v9 }
 0x16d   :  { %v209_v39 = vmul.f32 %v175_v30, %v175_v30 }
 0x16e   :  { %v82_v27 = vpop.permute.xlu1 %81  ;;  %v80_v28 = vpop.permute.xlu0 %79 }
 0x16f   :  { %v84_v32 = vadd.f32 %v82_v27, %v78_v15  ;;  %v83_v33 = vadd.f32 %v80_v28, %v77_v16 }
 0x171   :  { %v118_v47 = vmul.f32 %v84_v32, %v84_v32  ;;  %v117_v48 = vmul.f32 %v83_v33, %v83_v33 }
 0x172   :  { %v203_v35 = vpop.permute.xlu0 %202 }
 0x173   :  { %v205_v34 = vpop.permute.xlu1 %204  ;;  %v206_v41 = vadd.f32 %v203_v35, %v200_v20 }
 0x174   :  { %v207_v40 = vadd.f32 %v205_v34, %v201_v19 }
 0x175   :  { %v210_v44 = vsub.f32 %v208_v38, %v206_v41 }
 0x176   :  { %v211_v43 = vsub.f32 %v209_v39, %v207_v40  ;;  %v112_v49 = vpop.permute.xlu0 %111 }
 0x177   :  { %v114_v42 = vpop.permute.xlu1 %113  ;;  %v212_v52 = vmul.f32 0.5, %v210_v44  ;;  %v115_v54 = vadd.f32 %v112_v49, %v109_v24 }
 0x178   :  { %v213_v51 = vmul.f32 0.5, %v211_v43  ;;  %v116_v53 = vadd.f32 %v114_v42, %v110_v23 }
 0x179   :  { %v119_v57 = vsub.f32 %v117_v48, %v115_v54  ;;  %v219_v58 = vmul.f32 %v218_v46, %v212_v52  ;;  %v409_v52 = vld [vmem:[%s920_s7 + $0x8] sm:$0xff] }
 0x17a   :  { %v120_v56 = vsub.f32 %v118_v47, %v116_v53  ;;  %v220_v59 = vmul.f32 %v218_v46, %v213_v51  ;;  %v408_v51 = vld [vmem:[%s920_s7] sm:$0xff] }
 0x17b   :  { %v121_v62 = vmul.f32 0.5, %v119_v57  ;;  %v225_v63 = vadd.f32 %v224_v50, %v219_v58  ;;  %v644_v54 = vpack.c.bf16 %v409_v52, %v408_v51 }
 0x17c   :  { %v122_v61 = vmul.f32 0.5, %v120_v56  ;;  %v226_v0 = vadd.f32 %v224_v50, %v220_v59 }
 0x17d   :  { %v128_v2 = vmul.f32 %v127_v55, %v121_v62  ;;  %627 = vmatprep.mubr.msk.f32.mxu0 %vm236_vm0, %v225_v63  ;;  %645 = vmatprep.subr.bf16.mxu1 %v644_v54 }
 0x17e   :  { %v129_v1 = vmul.f32 %v127_v55, %v122_v61  ;;  %628 = vmatmul.mubr.msk.f32.vlgmr.msra.gmra.mrb[0].mxu0 %vm236_vm0, %v226_v0  ;;  %647 = vmatpush3.bf16.msra.mxu1 %v644_v54 }
 0x17f   :  { %v134_v4 = vadd.f32 %v133_v60, %v128_v2 }
 0x180   :  { %v135_v3 = vadd.f32 %v133_v60, %v129_v1 }
 0x181   :  { %630 = vmatprep.mubr.msk.f32.mxu0 %vm236_vm0, %v134_v4 }
 0x182   :  { %631 = vmatmul.mubr.msk.f32.gmra.mrb[2].mxu0 %vm236_vm0, %v135_v3 }
 0x251   :  { %v629_v6 = vpop.f32.mrb[0].mxu0 }
 0x252   :  { %v315_v7 = vpop.f32.mrb[1].mxu0  ;;  %v856_v11 = vadd.f32 %v629_v6, %v563_v5  ;;  %v496_v6 = vld [vmem:[%s923_s9] sm:$0x3] }
 0x253   :  { %v853_v8 = vadd.f32 %v563_v5, %v315_v7  ;;  %v568_v7 = vld [vmem:[%s924_s8] ss:$0 sm:$0xff] }
 0x255   :  { %336 = vrot.lane.b32.xlu0 %v853_v8, %s717_s15  ;;  %v632_v9 = vpop.f32.mrb[2].mxu0 }
 0x256   :  { %v325_v10 = vpop.f32.mrb[3].mxu0  ;;  %v859_v13 = vadd.f32 %v632_v9, %v563_v5 }
 0x257   :  { %v326_v12 = vadd.f32 %v563_v5, %v325_v10  ;;  %v19_v5 = vstv %s922_s11 }
 0x258   :  { %20 = vst [vmem:[#allocation2] sm:$0x1] %v19_v5 }
 0x259   :  { %338 = vrot.lane.b32.xlu0 %v856_v11, %s717_s15  ;;  %354 = vrot.lane.b32.xlu1 %v326_v12, %s717_s15 }
 0x25d   :  { %356 = vrot.lane.b32.xlu1 %v859_v13, %s717_s15 }
 0x2c7   :  { %v337_v14 = vpop.permute.xlu0 %336 }
 0x2c8   :  { %v342_v15 = vmul.f32 %v337_v14, %v853_v8 }
 0x2ca   :  { %v344_v16 = vsel %vm236_vm0, %v342_v15, 0.0 }
 0x2cb   :  { %v355_v17 = vpop.permute.xlu1 %354  ;;  %345 = vadd.xlane.f32.xlu0 %v344_v16  ;;  %v339_v18 = vpop.permute.xlu0 %338 }
 0x2cc   :  { %v360_v19 = vmul.f32 %v355_v17, %v326_v12  ;;  %v343_v20 = vmul.f32 %v339_v18, %v856_v11  ;;  %v571_v18 = vld [vmem:[%s925_s10] ss:$0 sm:$0xff] }
 0x2ce   :  { %v362_v21 = vsel %vm236_vm0, %v360_v19, 0.0  ;;  %v347_v22 = vsel %vm236_vm0, %v343_v20, 0.0 }
 0x2cf   :  { %363 = vadd.xlane.f32.xlu1 %v362_v21  ;;  %v357_v23 = vpop.permute.xlu1 %356  ;;  %348 = vadd.xlane.f32.xlu0 %v347_v22 }
 0x2d0   :  { %v361_v24 = vmul.f32 %v357_v23, %v859_v13 }
 0x2d2   :  { %v365_v25 = vsel %vm236_vm0, %v361_v24, 0.0  ;;  %v537_v24 = vld [vmem:[%s926_s2 + $0x8] sm:$0xff] }
 0x2d3   :  { %366 = vadd.xlane.f32.xlu0 %v365_v25 }
 0x358   :  { %v346_v26 = vpop.xlane.xlu0 %345 }
 0x359   :  { %v350_v29 = vmul.f32 0.25, %v346_v26 }
 0x35c   :  { %v364_v27 = vpop.xlane.xlu1 %363  ;;  %v349_v28 = vpop.xlane.xlu0 %348 }
 0x35d   :  { %v368_v30 = vmul.f32 0.25, %v364_v27  ;;  %v351_v37 = vmul.f32 0.25, %v349_v28  ;;  %v536_v27 = vld [vmem:[%s926_s2] sm:$0xff] }
 0x35f   :  { %v370_v32 = vmax.f32 %v350_v29, %v368_v30 }
 0x360   :  { %v367_v33 = vpop.xlane.xlu0 %366 }
 0x361   :  { %v372_v34 = vsub.f32 %v350_v29, %v370_v32  ;;  %v378_v35 = vsub.f32 %v368_v30, %v370_v32  ;;  %v369_v38 = vmul.f32 0.25, %v367_v33 }
 0x363   :  { %v374_v39 = vmul.f32 1.442695, %v372_v34  ;;  %v380_v40 = vmul.f32 1.442695, %v378_v35  ;;  %v371_v41 = vmax.f32 %v351_v37, %v369_v38 }
 0x365   :  { %653 = vpow2.f32 %v374_v39  ;;  %v373_v43 = vsub.f32 %v351_v37, %v371_v41  ;;  %v379_v44 = vsub.f32 %v369_v38, %v371_v41 }
 0x366   :  { %655 = vpow2.f32 %v380_v40 }
 0x367   :  { %v376_v45 = vmul.f32 1.442695, %v373_v43  ;;  %v382_v46 = vmul.f32 1.442695, %v379_v44 }
 0x369   :  { %657 = vpow2.f32 %v376_v45 }
 0x36a   :  { %659 = vpow2.f32 %v382_v46 }
 0x36f   :  { %v654_v47 = vpop.eup %653 }
 0x370   :  { %v656_v48 = vpop.eup %655 }
 0x371   :  { %v384_v42 = vadd.f32 %v656_v48, %v654_v47 }
 0x373   :  { %v658_v49 = vpop.eup %657  ;;  %661 = vrcp.f32 %v384_v42 }
 0x374   :  { %v660_v50 = vpop.eup %659 }
 0x375   :  { %v385_v53 = vadd.f32 %v660_v50, %v658_v49 }
 0x377   :  { %663 = vrcp.f32 %v385_v53 }
 0x37d   :  { %v662_v55 = vpop.eup %661 }
 0x37e   :  { %v388_v56 = vmul.f32 %v662_v55, %v654_v47  ;;  %v392_v57 = vmul.f32 %v662_v55, %v656_v48 }
 0x380   :  { %v390_v58 = vmul.f32 %v388_v56, %v853_v8  ;;  %v394_v59 = vmul.f32 %v392_v57, %v326_v12  ;;  %v500_v8 = vrot.slane %v496_v6, %v831_v31 }
 0x381   :  { %v664_v60 = vpop.eup %663 }
 0x382   :  { %v396_v61 = vadd.f32 %v394_v59, %v390_v58  ;;  %v389_v62 = vmul.f32 %v664_v60, %v658_v49  ;;  %v393_v63 = vmul.f32 %v664_v60, %v660_v50 }
 0x384   :  { %400 = vrot.lane.b32.xlu1 %v396_v61, %s718_s19  ;;  %v391_v0 = vmul.f32 %v389_v62, %v856_v11  ;;  %v395_v1 = vmul.f32 %v393_v63, %v859_v13  ;;  %v506_v11 = vrot.slane %v496_v6, %v834_v36  ;;  %v572_v36 = vld [vmem:[#allocation2] ss:$0 sm:$0xff] }
 0x386   :  { %v397_v2 = vadd.f32 %v395_v1, %v391_v0 }
 0x388   :  { %402 = vrot.lane.b32.xlu0 %v397_v2, %s718_s19 }
 0x3f6   :  { %v401_v3 = vpop.permute.xlu1 %400 }
 0x3f7   :  { %406 = vst.msk [vmem:[%s921_s13] sm:$0xff] %vm236_vm0, %v401_v3  ;;  %637 = vmatprep.mubr.msk.f32.mxu1 %vm236_vm0, %v401_v3 }
 0x3fa   :  { %v403_v4 = vpop.permute.xlu0 %402 }
 0x3fb   :  { %407 = vst.msk [vmem:[%s921_s13 + $0x8] sm:$0xff] %vm236_vm0, %v403_v4  ;;  %638 = vmatmul.mubr.msk.f32.vlgmr.msra.gmra.mrb[0].mxu1 %vm236_vm0, %v403_v4 }
 0x4ce   :  { %v639_v9 = vpop.f32.mrb[0].mxu1 }
 0x4cf   :  { %v493_v10 = vadd.f32 %v639_v9, %v568_v7  ;;  %v487_v12 = vpop.f32.mrb[1].mxu1 }
 0x4d0   :  { %v488_v13 = vadd.f32 %v568_v7, %v487_v12 }
 0x4d1   :  { %v502_v14 = vmul.f32 %v500_v8, %v493_v10 }
 0x4d2   :  { %v501_v15 = vmul.f32 %v500_v8, %v488_v13 }
 0x4d3   :  { %v508_v16 = vadd.f32 %v506_v11, %v502_v14 }
 0x4d4   :  { %v507_v17 = vadd.f32 %v506_v11, %v501_v15 }
 0x4d5   :  { %v510_v19 = vmax.f32 %v508_v16, 0.0 }
 0x4d6   :  { %v509_v20 = vmax.f32 %v507_v17, 0.0 }
 0x4d7   :  { %v519_v21 = vmul.f32 %v571_v18, %v510_v19 }
 0x4d8   :  { %v518_v22 = vmul.f32 %v571_v18, %v509_v20 }
 0x4d9   :  { %v524_v31 = vsel %vm520_vm1, %v519_v21, 0.0 }
 0x4da   :  { %525 = vadd.xlane.f32.xlu0 %v524_v31  ;;  %v521_v23 = vsel %vm520_vm1, %v518_v22, 0.0 }
 0x4db   :  { %522 = vadd.xlane.f32.xlu1 %v521_v23 }
 0x567   :  { %v526_v25 = vpop.xlane.xlu0 %525 }
 0x568   :  { %v535_v26 = vadd.f32 %v572_v36, %v526_v25  ;;  %v523_v28 = vpop.xlane.xlu1 %522 }
 0x569   :  { %v534_v29 = vadd.f32 %v572_v36, %v523_v28 }
 0x56a   :  { %v539_v30 = vadd.f32 %v537_v24, %v535_v26 }
 0x56b   :  { %v538_v32 = vadd.f32 %v536_v27, %v534_v29 }
 0x56c   :  { %v574_v33 = vmul.f32 -1.442695, %v539_v30 }
 0x56d   :  { %v573_v34 = vmul.f32 -1.442695, %v538_v32 }
 0x56e   :  { %665 = vpow2.f32 %v574_v33 }
 0x56f   :  { %667 = vpow2.f32 %v573_v34 }
 0x578   :  { %v666_v35 = vpop.eup %665 }
 0x579   :  { %v668_v37 = vpop.eup %667  ;;  %v547_v38 = vadd.f32 1.0, %v666_v35 }
 0x57a   :  { %v546_v39 = vadd.f32 1.0, %v668_v37 }
 0x57b   :  { %669 = vrcp.f32 %v547_v38 }
 0x57c   :  { %671 = vrcp.f32 %v546_v39 }
 0x585   :  { %v670_v40 = vpop.eup %669 }
 0x586   :  { %v672_v41 = vpop.eup %671  ;;  %554 = vst.msk [vmem:[%s927_s12 + $0x8] sm:$0xff] %vm552_vm2, %v670_v40 }
 0x587   :  { %553 = vst.msk [vmem:[%s927_s12] sm:$0xff] %vm552_vm2, %v672_v41 }

</bundles_post_ra>
